<compile_context>
chip_gen: v6e
topology: v6e:2x2x1
jax: 0.10.0
libtpu: 0.0.40
codegen_flags: <defaults>
</compile_context>

<pallas_src>
import functools

import jax
import jax.numpy as jnp
import numpy as np
from jax import lax
from jax.experimental import pallas as pl
from jax.experimental.pallas import tpu as pltpu

_LANES = 128
_SUB = 8                      # sublanes per accumulator vreg / per stream chunk
_N_SUM = 6                    # loss, p, t, p*p, t*t, p*t
_N_STATS = 10                 # + min_p, min_t, max_p, max_t
_OUT_ROWS = _N_STATS * _SUB   # 80 rows of (.,128): stat k occupies rows [8k, 8k+8)


def _round_up(x: int, m: int) -> int:
    return ((x + m - 1) // m) * m


def _value_loss_stats_kernel(pred_ref, targ_ref, out_ref, *, n_valid: int,
                             tile_rows: int, tiles_per_core: int,
                             loss_type: str):
    c = pl.program_id(0)          # TensorCore slab ("parallel")
    i = pl.program_id(1)          # row-tile within slab ("arbitrary")

    # Output block (80, 128) is resident across the arbitrary axis -> acts as
    # the accumulator; init once per slab.
    @pl.when(i == 0)
    def _init():
        out_ref[pl.ds(0, _N_SUM * _SUB), :] = jnp.zeros(
            (_N_SUM * _SUB, _LANES), jnp.float32)
        out_ref[pl.ds(6 * _SUB, 2 * _SUB), :] = jnp.full(
            (2 * _SUB, _LANES), jnp.inf, jnp.float32)
        out_ref[pl.ds(8 * _SUB, 2 * _SUB), :] = jnp.full(
            (2 * _SUB, _LANES), -jnp.inf, jnp.float32)

    tile_elems = tile_rows * _LANES
    chunk_elems = _SUB * _LANES
    g = c * tiles_per_core + i            # global tile index
    tile_base = g * tile_elems            # global element offset of this tile
    nchunks = tile_rows // _SUB

    def run(masked: bool):
        if masked:
            # Hoisted out of the loop (broadcast_in_dim is not CSE'd by JAX).
            within = (lax.broadcasted_iota(jnp.int32, (_SUB, _LANES), 0) * _LANES
                      + lax.broadcasted_iota(jnp.int32, (_SUB, _LANES), 1))

        def body(j, carry):
            s_l, s_p, s_t, s_pp, s_tt, s_pt, mn_p, mn_t, mx_p, mx_t = carry
            r0 = pl.multiple_of(j * _SUB, _SUB)
            p = pred_ref[pl.ds(r0, _SUB), :].astype(jnp.float32)
            t = targ_ref[pl.ds(r0, _SUB), :].astype(jnp.float32)
            if masked:
                valid = within < (n_valid - tile_base - j * chunk_elems)
                p_mn = jnp.where(valid, p, jnp.inf)
                t_mn = jnp.where(valid, t, jnp.inf)
                p_mx = jnp.where(valid, p, -jnp.inf)
                t_mx = jnp.where(valid, t, -jnp.inf)
                p = jnp.where(valid, p, 0.0)
                t = jnp.where(valid, t, 0.0)
            else:
                p_mn = p_mx = p
                t_mn = t_mx = t
            d = p - t
            lplane = d * d if loss_type == "l2" else jnp.abs(d)
            return (s_l + lplane, s_p + p, s_t + t,
                    s_pp + p * p, s_tt + t * t, s_pt + p * t,
                    jnp.minimum(mn_p, p_mn), jnp.minimum(mn_t, t_mn),
                    jnp.maximum(mx_p, p_mx), jnp.maximum(mx_t, t_mx))

        zeros = jnp.zeros((_SUB, _LANES), jnp.float32)
        pinf = jnp.full((_SUB, _LANES), jnp.inf, jnp.float32)
        ninf = jnp.full((_SUB, _LANES), -jnp.inf, jnp.float32)
        init = (zeros,) * _N_SUM + (pinf, pinf, ninf, ninf)
        res = lax.fori_loop(0, nchunks, body, init, unroll=min(8, nchunks))

        # Fold one vreg per statistic into the resident output block.
        for k in range(_N_SUM):
            sl = pl.ds(k * _SUB, _SUB)
            out_ref[sl, :] = out_ref[sl, :] + res[k]
        out_ref[pl.ds(6 * _SUB, _SUB), :] = jnp.minimum(
            out_ref[pl.ds(6 * _SUB, _SUB), :], res[6])
        out_ref[pl.ds(7 * _SUB, _SUB), :] = jnp.minimum(
            out_ref[pl.ds(7 * _SUB, _SUB), :], res[7])
        out_ref[pl.ds(8 * _SUB, _SUB), :] = jnp.maximum(
            out_ref[pl.ds(8 * _SUB, _SUB), :], res[8])
        out_ref[pl.ds(9 * _SUB, _SUB), :] = jnp.maximum(
            out_ref[pl.ds(9 * _SUB, _SUB), :], res[9])

    # Only tiles overlapping the padded / out-of-range tail pay for masking.
    needs_mask = (tile_base + tile_elems) > n_valid

    @pl.when(jnp.logical_not(needs_mask))
    def _fast():
        run(masked=False)

    @pl.when(needs_mask)
    def _tail():
        run(masked=True)


def value_loss(pred: jax.Array, targ: jax.Array, loss_type: str = "l2"):
    """Pallas implementation of ValueLoss.forward (loss_type picks the
    ValueL1 / ValueL2 subclass behaviour for the abstract self._loss)."""
    assert pred.shape == targ.shape, "pred/targ shape mismatch"
    assert loss_type in ("l1", "l2")
    batch = pred.shape[0] if pred.ndim >= 1 else 1

    p_flat = pred.reshape(-1)               # native dtype, cast in-kernel
    t_flat = targ.reshape(-1)
    n = int(p_flat.shape[0])

    rows8 = max(_SUB, _round_up(pl.cdiv(n, _LANES), _SUB))
    padded = rows8 * _LANES
    if padded != n:                          # skip the copy when aligned
        p_flat = jnp.pad(p_flat, (0, padded - n))
        t_flat = jnp.pad(t_flat, (0, padded - n))
    p2d = p_flat.reshape(rows8, _LANES)
    t2d = t_flat.reshape(rows8, _LANES)

    tile_rows = min(1024, rows8)             # multiple of 8 by construction
    num_tiles = pl.cdiv(rows8, tile_rows)
    num_cores = 2 if num_tiles >= 2 else 1   # v7x: split tiles across both TCs
    tiles_per_core = pl.cdiv(num_tiles, num_cores)

    def in_index_map(c, i):
        # Clamp so we never request a block starting out of bounds; the
        # in-kernel mask (keyed on the *unclamped* global index) zeroes any
        # such slot's contribution.
        return (jnp.minimum(c * tiles_per_core + i, num_tiles - 1), 0)

    kernel = functools.partial(
        _value_loss_stats_kernel, n_valid=n, tile_rows=tile_rows,
        tiles_per_core=tiles_per_core, loss_type=loss_type)

    stats = pl.pallas_call(
        kernel,
        out_shape=jax.ShapeDtypeStruct((num_cores, _OUT_ROWS, _LANES),
                                       jnp.float32),
        grid=(num_cores, tiles_per_core),
        in_specs=[pl.BlockSpec((tile_rows, _LANES), in_index_map),
                  pl.BlockSpec((tile_rows, _LANES), in_index_map)],
        out_specs=pl.BlockSpec((None, _OUT_ROWS, _LANES),
                               lambda c, i: (c, 0, 0)),
        compiler_params=pltpu.CompilerParams(
            dimension_semantics=("parallel", "arbitrary")),
    )(p2d, t2d)

    # Tiny finalize (fused by XLA): combine per-core slabs + vreg reductions.
    planes = stats.reshape(num_cores, _N_STATS, _SUB, _LANES)
    sums = jnp.sum(planes[:, :_N_SUM], axis=(0, 2, 3))     # (6,)
    mins = jnp.min(planes[:, 6:8], axis=(0, 2, 3))         # (2,)
    maxs = jnp.max(planes[:, 8:10], axis=(0, 2, 3))        # (2,)

    inv_n = jnp.float32(1.0 / n)
    loss_sum, s_p, s_t, s_pp, s_tt, s_pt = (sums[k] for k in range(_N_SUM))
    loss = loss_sum * inv_n
    mean_pred = s_p * inv_n
    mean_targ = s_t * inv_n

    if batch > 1:
        # TODO(synk): one-pass Pearson in f32 can cancel badly when
        # |mean| >> std; a pilot-shifted / Welford accumulation would track the
        # original float64 np.corrcoef more closely for such data.
        cov = s_pt * inv_n - mean_pred * mean_targ
        var_p = jnp.maximum(s_pp * inv_n - mean_pred * mean_pred, 0.0)
        var_t = jnp.maximum(s_tt * inv_n - mean_targ * mean_targ, 0.0)
        denom = var_p * var_t
        corr = jnp.where(denom > 0, cov * lax.rsqrt(denom),
                         jnp.float32(jnp.nan))
    else:
        corr = jnp.float32(jnp.nan)          # matches np.NaN branch, len == 1

    info = {
        "mean_pred": mean_pred, "mean_targ": mean_targ,
        "min_pred": mins[0], "min_targ": mins[1],
        "max_pred": maxs[0], "max_targ": maxs[1],
        "corr": corr,
    }
    return loss, info


def _ref_stats(p_np, t_np, loss_type):
    d = p_np - t_np
    loss = np.mean(d * d) if loss_type == "l2" else np.mean(np.abs(d))
    corr = np.corrcoef(p_np, t_np)[0, 1]
    return loss, corr


if __name__ == "__main__":
    key = jax.random.PRNGKey(0)

    # --- small test: typical ValueLoss input, (B, 1) values -----------------
    k1, k2, k3, k4 = jax.random.split(key, 4)
    B = 32
    pred = jax.random.normal(k1, (B, 1), dtype=jnp.float32)
    targ = pred + 0.1 * jax.random.normal(k2, (B, 1), dtype=jnp.float32)

    loss, info = value_loss(pred, targ, loss_type="l2")
    loss = jax.block_until_ready(loss)

    p_np = np.asarray(pred, dtype=np.float64).squeeze()
    t_np = np.asarray(targ, dtype=np.float64).squeeze()
    ref_loss, ref_corr = _ref_stats(p_np, t_np, "l2")
    assert np.allclose(float(loss), ref_loss, rtol=1e-5, atol=1e-6)
    assert np.allclose(float(info["mean_pred"]), p_np.mean(), rtol=1e-5, atol=1e-6)
    assert np.allclose(float(info["mean_targ"]), t_np.mean(), rtol=1e-5, atol=1e-6)
    assert np.allclose(float(info["min_pred"]), p_np.min(), rtol=1e-6, atol=1e-6)
    assert np.allclose(float(info["min_targ"]), t_np.min(), rtol=1e-6, atol=1e-6)
    assert np.allclose(float(info["max_pred"]), p_np.max(), rtol=1e-6, atol=1e-6)
    assert np.allclose(float(info["max_targ"]), t_np.max(), rtol=1e-6, atol=1e-6)
    assert np.allclose(float(info["corr"]), ref_corr, rtol=1e-4, atol=1e-4)

    # L1 variant (ValueL1 subclass behaviour)
    loss1, _ = value_loss(pred, targ, loss_type="l1")
    loss1 = jax.block_until_ready(loss1)
    ref_loss1, _ = _ref_stats(p_np, t_np, "l1")
    assert np.allclose(float(loss1), ref_loss1, rtol=1e-5, atol=1e-6)

    # --- coverage test: multi-tile / two-slab / ragged-tail path ------------
    N2 = 2048 * 128 + 7000              # -> 3 row-tiles, grid (2, 2), masked tail
    pred2 = jax.random.normal(k3, (N2, 1), dtype=jnp.float32)
    targ2 = pred2 + 0.1 * jax.random.normal(k4, (N2, 1), dtype=jnp.float32)
    loss2, info2 = value_loss(pred2, targ2, loss_type="l2")
    loss2 = jax.block_until_ready(loss2)

    p2_np = np.asarray(pred2, dtype=np.float64).squeeze()
    t2_np = np.asarray(targ2, dtype=np.float64).squeeze()
    ref_loss2, ref_corr2 = _ref_stats(p2_np, t2_np, "l2")
    assert np.allclose(float(loss2), ref_loss2, rtol=1e-4, atol=1e-6)
    assert np.allclose(float(info2["mean_pred"]), p2_np.mean(), rtol=1e-4, atol=1e-4)
    assert np.allclose(float(info2["mean_targ"]), t2_np.mean(), rtol=1e-4, atol=1e-4)
    assert np.allclose(float(info2["min_pred"]), p2_np.min(), rtol=1e-5, atol=1e-5)
    assert np.allclose(float(info2["min_targ"]), t2_np.min(), rtol=1e-5, atol=1e-5)
    assert np.allclose(float(info2["max_pred"]), p2_np.max(), rtol=1e-5, atol=1e-5)
    assert np.allclose(float(info2["max_targ"]), t2_np.max(), rtol=1e-5, atol=1e-5)
    assert np.allclose(float(info2["corr"]), ref_corr2, rtol=1e-3, atol=1e-3)

    print("KERNEL_OK")
</pallas_src>

<mosaic_0001>
module attributes {stable_mosaic.version = 11 : i64} {
  func.func @_value_loss_stats_kernel(%arg0: i32, %arg1: i32, %arg2: memref<8x128xf32, #tpu.memory_space<vmem>>, %arg3: memref<8x128xf32, #tpu.memory_space<vmem>>, %arg4: memref<1x80x128xf32, #tpu.memory_space<vmem>>) attributes {dimension_semantics = [#tpu.dimension_semantics<parallel>, #tpu.dimension_semantics<arbitrary>], iteration_bounds = array<i64: 1, 1>, scalar_prefetch = 0 : i64, scratch_operands = 0 : i64, tpu.core_type = #tpu.core_type<tc>, window_params = [{transform_indices = @transform_0, window_bounds = array<i64: 8, 128>}, {transform_indices = @transform_1, window_bounds = array<i64: 8, 128>}, {transform_indices = @transform_2, window_bounds = array<i64: 1, 80, 128>}]} {
    %c0_i32 = arith.constant 0 : i32
    %0 = arith.cmpi eq, %arg1, %c0_i32 : i32
    %1 = arith.extui %0 : i1 to i32
    %c0_i32_0 = arith.constant 0 : i32
    %2 = arith.cmpi ne, %1, %c0_i32_0 : i32
    scf.if %2 {
      %cst = arith.constant 0.000000e+00 : f32
      %13 = vector.broadcast %cst : f32 to vector<48x128xf32>
      %c0 = arith.constant 0 : index
      %c0_4 = arith.constant 0 : index
      %c0_5 = arith.constant 0 : index
      %14 = vector.load %arg4[%c0, %c0_4, %c0_5] : memref<1x80x128xf32, #tpu.memory_space<vmem>>, vector<1x48x128xf32>
      %15 = vector.shape_cast %14 : vector<1x48x128xf32> to vector<48x128xf32>
      %16 = vector.shape_cast %13 : vector<48x128xf32> to vector<1x48x128xf32>
      tpu.vector_store %arg4[%c0, %c0_4, %c0_5], %16 {strides = array<i32>} : memref<1x80x128xf32, #tpu.memory_space<vmem>>, vector<1x48x128xf32>,
      %cst_6 = arith.constant 0x7F800000 : f32
      %17 = vector.broadcast %cst_6 : f32 to vector<16x128xf32>
      %c0_7 = arith.constant 0 : index
      %c48 = arith.constant 48 : index
      %c0_8 = arith.constant 0 : index
      %18 = vector.load %arg4[%c0_7, %c48, %c0_8] : memref<1x80x128xf32, #tpu.memory_space<vmem>>, vector<1x16x128xf32>
      %19 = vector.shape_cast %18 : vector<1x16x128xf32> to vector<16x128xf32>
      %20 = vector.shape_cast %17 : vector<16x128xf32> to vector<1x16x128xf32>
      tpu.vector_store %arg4[%c0_7, %c48, %c0_8], %20 {strides = array<i32>} : memref<1x80x128xf32, #tpu.memory_space<vmem>>, vector<1x16x128xf32>,
      %cst_9 = arith.constant 0xFF800000 : f32
      %21 = vector.broadcast %cst_9 : f32 to vector<16x128xf32>
      %c0_10 = arith.constant 0 : index
      %c64 = arith.constant 64 : index
      %c0_11 = arith.constant 0 : index
      %22 = vector.load %arg4[%c0_10, %c64, %c0_11] : memref<1x80x128xf32, #tpu.memory_space<vmem>>, vector<1x16x128xf32>
      %23 = vector.shape_cast %22 : vector<1x16x128xf32> to vector<16x128xf32>
      %24 = vector.shape_cast %21 : vector<16x128xf32> to vector<1x16x128xf32>
      tpu.vector_store %arg4[%c0_10, %c64, %c0_11], %24 {strides = array<i32>} : memref<1x80x128xf32, #tpu.memory_space<vmem>>, vector<1x16x128xf32>,
    } else {
    }
    %c1_i32 = arith.constant 1 : i32
    %3 = arith.muli %arg0, %c1_i32 : i32
    %4 = arith.addi %3, %arg1 : i32
    %c1024_i32 = arith.constant 1024 : i32
    %5 = arith.muli %4, %c1024_i32 : i32
    %c1024_i32_1 = arith.constant 1024 : i32
    %6 = arith.addi %5, %c1024_i32_1 : i32
    %c32_i32 = arith.constant 32 : i32
    %7 = arith.cmpi sgt, %6, %c32_i32 : i32
    %true = arith.constant true
    %8 = arith.xori %7, %true : i1
    %9 = arith.extui %8 : i1 to i32
    %c0_i32_2 = arith.constant 0 : i32
    %10 = arith.cmpi ne, %9, %c0_i32_2 : i32
    scf.if %10 {
      %cst = arith.constant 0.000000e+00 : f32
      %13 = vector.broadcast %cst : f32 to vector<8x128xf32>
      %cst_4 = arith.constant 0x7F800000 : f32
      %14 = vector.broadcast %cst_4 : f32 to vector<8x128xf32>
      %cst_5 = arith.constant 0xFF800000 : f32
      %15 = vector.broadcast %cst_5 : f32 to vector<8x128xf32>
      %c0_i32_6 = arith.constant 0 : i32
      %c8_i32 = arith.constant 8 : i32
      %16 = arith.muli %c0_i32_6, %c8_i32 : i32
      %17 = tpu.assume_multiple %16, 8 : i32
      %18 = arith.index_cast %17 : i32 to index
      %c0 = arith.constant 0 : index
      %19 = vector.load %arg2[%18, %c0] : memref<8x128xf32, #tpu.memory_space<vmem>>, vector<8x128xf32>
      %20 = arith.index_cast %17 : i32 to index
      %c0_7 = arith.constant 0 : index
      %21 = vector.load %arg3[%20, %c0_7] : memref<8x128xf32, #tpu.memory_space<vmem>>, vector<8x128xf32>
      %22 = arith.subf %19, %21 : vector<8x128xf32>
      %23 = arith.mulf %22, %22 : vector<8x128xf32>
      %24 = arith.addf %13, %23 : vector<8x128xf32>
      %25 = arith.addf %13, %19 : vector<8x128xf32>
      %26 = arith.addf %13, %21 : vector<8x128xf32>
      %27 = arith.mulf %19, %19 : vector<8x128xf32>
      %28 = arith.addf %13, %27 : vector<8x128xf32>
      %29 = arith.mulf %21, %21 : vector<8x128xf32>
      %30 = arith.addf %13, %29 : vector<8x128xf32>
      %31 = arith.mulf %19, %21 : vector<8x128xf32>
      %32 = arith.addf %13, %31 : vector<8x128xf32>
      %33 = arith.minimumf %14, %19 : vector<8x128xf32>
      %34 = arith.minimumf %14, %21 : vector<8x128xf32>
      %35 = arith.maximumf %15, %19 : vector<8x128xf32>
      %36 = arith.maximumf %15, %21 : vector<8x128xf32>
      %c1_i32_8 = arith.constant 1 : i32
      %c0_9 = arith.constant 0 : index
      %c0_10 = arith.constant 0 : index
      %c0_11 = arith.constant 0 : index
      %37 = vector.load %arg4[%c0_9, %c0_10, %c0_11] : memref<1x80x128xf32, #tpu.memory_space<vmem>>, vector<1x8x128xf32>
      %38 = vector.shape_cast %37 : vector<1x8x128xf32> to vector<8x128xf32>
      %39 = arith.addf %38, %24 : vector<8x128xf32>
      %c0_12 = arith.constant 0 : index
      %c0_13 = arith.constant 0 : index
      %c0_14 = arith.constant 0 : index
      %40 = vector.load %arg4[%c0_12, %c0_13, %c0_14] : memref<1x80x128xf32, #tpu.memory_space<vmem>>, vector<1x8x128xf32>
      %41 = vector.shape_cast %40 : vector<1x8x128xf32> to vector<8x128xf32>
      %42 = vector.shape_cast %39 : vector<8x128xf32> to vector<1x8x128xf32>
      tpu.vector_store %arg4[%c0_12, %c0_13, %c0_14], %42 {strides = array<i32>} : memref<1x80x128xf32, #tpu.memory_space<vmem>>, vector<1x8x128xf32>,
      %c0_15 = arith.constant 0 : index
      %c8 = arith.constant 8 : index
      %c0_16 = arith.constant 0 : index
      %43 = vector.load %arg4[%c0_15, %c8, %c0_16] : memref<1x80x128xf32, #tpu.memory_space<vmem>>, vector<1x8x128xf32>
      %44 = vector.shape_cast %43 : vector<1x8x128xf32> to vector<8x128xf32>
      %45 = arith.addf %44, %25 : vector<8x128xf32>
      %c0_17 = arith.constant 0 : index
      %c8_18 = arith.constant 8 : index
      %c0_19 = arith.constant 0 : index
      %46 = vector.load %arg4[%c0_17, %c8_18, %c0_19] : memref<1x80x128xf32, #tpu.memory_space<vmem>>, vector<1x8x128xf32>
      %47 = vector.shape_cast %46 : vector<1x8x128xf32> to vector<8x128xf32>
      %48 = vector.shape_cast %45 : vector<8x128xf32> to vector<1x8x128xf32>
      tpu.vector_store %arg4[%c0_17, %c8_18, %c0_19], %48 {strides = array<i32>} : memref<1x80x128xf32, #tpu.memory_space<vmem>>, vector<1x8x128xf32>,
      %c0_20 = arith.constant 0 : index
      %c16 = arith.constant 16 : index
      %c0_21 = arith.constant 0 : index
      %49 = vector.load %arg4[%c0_20, %c16, %c0_21] : memref<1x80x128xf32, #tpu.memory_space<vmem>>, vector<1x8x128xf32>
      %50 = vector.shape_cast %49 : vector<1x8x128xf32> to vector<8x128xf32>
      %51 = arith.addf %50, %26 : vector<8x128xf32>
      %c0_22 = arith.constant 0 : index
      %c16_23 = arith.constant 16 : index
      %c0_24 = arith.constant 0 : index
      %52 = vector.load %arg4[%c0_22, %c16_23, %c0_24] : memref<1x80x128xf32, #tpu.memory_space<vmem>>, vector<1x8x128xf32>
      %53 = vector.shape_cast %52 : vector<1x8x128xf32> to vector<8x128xf32>
      %54 = vector.shape_cast %51 : vector<8x128xf32> to vector<1x8x128xf32>
      tpu.vector_store %arg4[%c0_22, %c16_23, %c0_24], %54 {strides = array<i32>} : memref<1x80x128xf32, #tpu.memory_space<vmem>>, vector<1x8x128xf32>,
      %c0_25 = arith.constant 0 : index
      %c24 = arith.constant 24 : index
      %c0_26 = arith.constant 0 : index
      %55 = vector.load %arg4[%c0_25, %c24, %c0_26] : memref<1x80x128xf32, #tpu.memory_space<vmem>>, vector<1x8x128xf32>
      %56 = vector.shape_cast %55 : vector<1x8x128xf32> to vector<8x128xf32>
      %57 = arith.addf %56, %28 : vector<8x128xf32>
      %c0_27 = arith.constant 0 : index
      %c24_28 = arith.constant 24 : index
      %c0_29 = arith.constant 0 : index
      %58 = vector.load %arg4[%c0_27, %c24_28, %c0_29] : memref<1x80x128xf32, #tpu.memory_space<vmem>>, vector<1x8x128xf32>
      %59 = vector.shape_cast %58 : vector<1x8x128xf32> to vector<8x128xf32>
      %60 = vector.shape_cast %57 : vector<8x128xf32> to vector<1x8x128xf32>
      tpu.vector_store %arg4[%c0_27, %c24_28, %c0_29], %60 {strides = array<i32>} : memref<1x80x128xf32, #tpu.memory_space<vmem>>, vector<1x8x128xf32>,
      %c0_30 = arith.constant 0 : index
      %c32 = arith.constant 32 : index
      %c0_31 = arith.constant 0 : index
      %61 = vector.load %arg4[%c0_30, %c32, %c0_31] : memref<1x80x128xf32, #tpu.memory_space<vmem>>, vector<1x8x128xf32>
      %62 = vector.shape_cast %61 : vector<1x8x128xf32> to vector<8x128xf32>
      %63 = arith.addf %62, %30 : vector<8x128xf32>
      %c0_32 = arith.constant 0 : index
      %c32_33 = arith.constant 32 : index
      %c0_34 = arith.constant 0 : index
      %64 = vector.load %arg4[%c0_32, %c32_33, %c0_34] : memref<1x80x128xf32, #tpu.memory_space<vmem>>, vector<1x8x128xf32>
      %65 = vector.shape_cast %64 : vector<1x8x128xf32> to vector<8x128xf32>
      %66 = vector.shape_cast %63 : vector<8x128xf32> to vector<1x8x128xf32>
      tpu.vector_store %arg4[%c0_32, %c32_33, %c0_34], %66 {strides = array<i32>} : memref<1x80x128xf32, #tpu.memory_space<vmem>>, vector<1x8x128xf32>,
      %c0_35 = arith.constant 0 : index
      %c40 = arith.constant 40 : index
      %c0_36 = arith.constant 0 : index
      %67 = vector.load %arg4[%c0_35, %c40, %c0_36] : memref<1x80x128xf32, #tpu.memory_space<vmem>>, vector<1x8x128xf32>
      %68 = vector.shape_cast %67 : vector<1x8x128xf32> to vector<8x128xf32>
      %69 = arith.addf %68, %32 : vector<8x128xf32>
      %c0_37 = arith.constant 0 : index
      %c40_38 = arith.constant 40 : index
      %c0_39 = arith.constant 0 : index
      %70 = vector.load %arg4[%c0_37, %c40_38, %c0_39] : memref<1x80x128xf32, #tpu.memory_space<vmem>>, vector<1x8x128xf32>
      %71 = vector.shape_cast %70 : vector<1x8x128xf32> to vector<8x128xf32>
      %72 = vector.shape_cast %69 : vector<8x128xf32> to vector<1x8x128xf32>
      tpu.vector_store %arg4[%c0_37, %c40_38, %c0_39], %72 {strides = array<i32>} : memref<1x80x128xf32, #tpu.memory_space<vmem>>, vector<1x8x128xf32>,
      %c0_40 = arith.constant 0 : index
      %c48 = arith.constant 48 : index
      %c0_41 = arith.constant 0 : index
      %73 = vector.load %arg4[%c0_40, %c48, %c0_41] : memref<1x80x128xf32, #tpu.memory_space<vmem>>, vector<1x8x128xf32>
      %74 = vector.shape_cast %73 : vector<1x8x128xf32> to vector<8x128xf32>
      %75 = arith.minimumf %74, %33 : vector<8x128xf32>
      %c0_42 = arith.constant 0 : index
      %c48_43 = arith.constant 48 : index
      %c0_44 = arith.constant 0 : index
      %76 = vector.load %arg4[%c0_42, %c48_43, %c0_44] : memref<1x80x128xf32, #tpu.memory_space<vmem>>, vector<1x8x128xf32>
      %77 = vector.shape_cast %76 : vector<1x8x128xf32> to vector<8x128xf32>
      %78 = vector.shape_cast %75 : vector<8x128xf32> to vector<1x8x128xf32>
      tpu.vector_store %arg4[%c0_42, %c48_43, %c0_44], %78 {strides = array<i32>} : memref<1x80x128xf32, #tpu.memory_space<vmem>>, vector<1x8x128xf32>,
      %c0_45 = arith.constant 0 : index
      %c56 = arith.constant 56 : index
      %c0_46 = arith.constant 0 : index
      %79 = vector.load %arg4[%c0_45, %c56, %c0_46] : memref<1x80x128xf32, #tpu.memory_space<vmem>>, vector<1x8x128xf32>
      %80 = vector.shape_cast %79 : vector<1x8x128xf32> to vector<8x128xf32>
      %81 = arith.minimumf %80, %34 : vector<8x128xf32>
      %c0_47 = arith.constant 0 : index
      %c56_48 = arith.constant 56 : index
      %c0_49 = arith.constant 0 : index
      %82 = vector.load %arg4[%c0_47, %c56_48, %c0_49] : memref<1x80x128xf32, #tpu.memory_space<vmem>>, vector<1x8x128xf32>
      %83 = vector.shape_cast %82 : vector<1x8x128xf32> to vector<8x128xf32>
      %84 = vector.shape_cast %81 : vector<8x128xf32> to vector<1x8x128xf32>
      tpu.vector_store %arg4[%c0_47, %c56_48, %c0_49], %84 {strides = array<i32>} : memref<1x80x128xf32, #tpu.memory_space<vmem>>, vector<1x8x128xf32>,
      %c0_50 = arith.constant 0 : index
      %c64 = arith.constant 64 : index
      %c0_51 = arith.constant 0 : index
      %85 = vector.load %arg4[%c0_50, %c64, %c0_51] : memref<1x80x128xf32, #tpu.memory_space<vmem>>, vector<1x8x128xf32>
      %86 = vector.shape_cast %85 : vector<1x8x128xf32> to vector<8x128xf32>
      %87 = arith.maximumf %86, %35 : vector<8x128xf32>
      %c0_52 = arith.constant 0 : index
      %c64_53 = arith.constant 64 : index
      %c0_54 = arith.constant 0 : index
      %88 = vector.load %arg4[%c0_52, %c64_53, %c0_54] : memref<1x80x128xf32, #tpu.memory_space<vmem>>, vector<1x8x128xf32>
      %89 = vector.shape_cast %88 : vector<1x8x128xf32> to vector<8x128xf32>
      %90 = vector.shape_cast %87 : vector<8x128xf32> to vector<1x8x128xf32>
      tpu.vector_store %arg4[%c0_52, %c64_53, %c0_54], %90 {strides = array<i32>} : memref<1x80x128xf32, #tpu.memory_space<vmem>>, vector<1x8x128xf32>,
      %c0_55 = arith.constant 0 : index
      %c72 = arith.constant 72 : index
      %c0_56 = arith.constant 0 : index
      %91 = vector.load %arg4[%c0_55, %c72, %c0_56] : memref<1x80x128xf32, #tpu.memory_space<vmem>>, vector<1x8x128xf32>
      %92 = vector.shape_cast %91 : vector<1x8x128xf32> to vector<8x128xf32>
      %93 = arith.maximumf %92, %36 : vector<8x128xf32>
      %c0_57 = arith.constant 0 : index
      %c72_58 = arith.constant 72 : index
      %c0_59 = arith.constant 0 : index
      %94 = vector.load %arg4[%c0_57, %c72_58, %c0_59] : memref<1x80x128xf32, #tpu.memory_space<vmem>>, vector<1x8x128xf32>
      %95 = vector.shape_cast %94 : vector<1x8x128xf32> to vector<8x128xf32>
      %96 = vector.shape_cast %93 : vector<8x128xf32> to vector<1x8x128xf32>
      tpu.vector_store %arg4[%c0_57, %c72_58, %c0_59], %96 {strides = array<i32>} : memref<1x80x128xf32, #tpu.memory_space<vmem>>, vector<1x8x128xf32>,
    } else {
    }
    %11 = arith.extui %7 : i1 to i32
    %c0_i32_3 = arith.constant 0 : i32
    %12 = arith.cmpi ne, %11, %c0_i32_3 : i32
    scf.if %12 {
      %13 = tpu.iota {dimensions = array<i32: 0>} : vector<8x128xi32>
      %c128_i32 = arith.constant 128 : i32
      %14 = vector.broadcast %c128_i32 : i32 to vector<8x128xi32>
      %15 = arith.muli %13, %14 : vector<8x128xi32>
      %16 = tpu.iota {dimensions = array<i32: 1>} : vector<8x128xi32>
      %17 = arith.addi %15, %16 : vector<8x128xi32>
      %cst = arith.constant 0.000000e+00 : f32
      %18 = vector.broadcast %cst : f32 to vector<8x128xf32>
      %cst_4 = arith.constant 0x7F800000 : f32
      %19 = vector.broadcast %cst_4 : f32 to vector<8x128xf32>
      %cst_5 = arith.constant 0xFF800000 : f32
      %20 = vector.broadcast %cst_5 : f32 to vector<8x128xf32>
      %c0_i32_6 = arith.constant 0 : i32
      %c8_i32 = arith.constant 8 : i32
      %21 = arith.muli %c0_i32_6, %c8_i32 : i32
      %22 = tpu.assume_multiple %21, 8 : i32
      %23 = arith.index_cast %22 : i32 to index
      %c0 = arith.constant 0 : index
      %24 = vector.load %arg2[%23, %c0] : memref<8x128xf32, #tpu.memory_space<vmem>>, vector<8x128xf32>
      %25 = arith.index_cast %22 : i32 to index
      %c0_7 = arith.constant 0 : index
      %26 = vector.load %arg3[%25, %c0_7] : memref<8x128xf32, #tpu.memory_space<vmem>>, vector<8x128xf32>
      %c32_i32_8 = arith.constant 32 : i32
      %27 = arith.subi %c32_i32_8, %5 : i32
      %c1024_i32_9 = arith.constant 1024 : i32
      %28 = arith.muli %c0_i32_6, %c1024_i32_9 : i32
      %29 = arith.subi %27, %28 : i32
      %30 = vector.broadcast %29 : i32 to vector<8x128xi32>
      %31 = arith.cmpi slt, %17, %30 : vector<8x128xi32>
      %cst_10 = arith.constant 0x7F800000 : f32
      %32 = vector.broadcast %cst_10 : f32 to vector<8x128xf32>
      %33 = arith.select %31, %24, %32 : vector<8x128xi1>, vector<8x128xf32>
      %cst_11 = arith.constant 0x7F800000 : f32
      %34 = vector.broadcast %cst_11 : f32 to vector<8x128xf32>
      %35 = arith.select %31, %26, %34 : vector<8x128xi1>, vector<8x128xf32>
      %cst_12 = arith.constant 0xFF800000 : f32
      %36 = vector.broadcast %cst_12 : f32 to vector<8x128xf32>
      %37 = arith.select %31, %24, %36 : vector<8x128xi1>, vector<8x128xf32>
      %cst_13 = arith.constant 0xFF800000 : f32
      %38 = vector.broadcast %cst_13 : f32 to vector<8x128xf32>
      %39 = arith.select %31, %26, %38 : vector<8x128xi1>, vector<8x128xf32>
      %cst_14 = arith.constant 0.000000e+00 : f32
      %40 = vector.broadcast %cst_14 : f32 to vector<8x128xf32>
      %41 = arith.select %31, %24, %40 : vector<8x128xi1>, vector<8x128xf32>
      %cst_15 = arith.constant 0.000000e+00 : f32
      %42 = vector.broadcast %cst_15 : f32 to vector<8x128xf32>
      %43 = arith.select %31, %26, %42 : vector<8x128xi1>, vector<8x128xf32>
      %44 = arith.subf %41, %43 : vector<8x128xf32>
      %45 = arith.mulf %44, %44 : vector<8x128xf32>
      %46 = arith.addf %18, %45 : vector<8x128xf32>
      %47 = arith.addf %18, %41 : vector<8x128xf32>
      %48 = arith.addf %18, %43 : vector<8x128xf32>
      %49 = arith.mulf %41, %41 : vector<8x128xf32>
      %50 = arith.addf %18, %49 : vector<8x128xf32>
      %51 = arith.mulf %43, %43 : vector<8x128xf32>
      %52 = arith.addf %18, %51 : vector<8x128xf32>
      %53 = arith.mulf %41, %43 : vector<8x128xf32>
      %54 = arith.addf %18, %53 : vector<8x128xf32>
      %55 = arith.minimumf %19, %33 : vector<8x128xf32>
      %56 = arith.minimumf %19, %35 : vector<8x128xf32>
      %57 = arith.maximumf %20, %37 : vector<8x128xf32>
      %58 = arith.maximumf %20, %39 : vector<8x128xf32>
      %c1_i32_16 = arith.constant 1 : i32
      %c0_17 = arith.constant 0 : index
      %c0_18 = arith.constant 0 : index
      %c0_19 = arith.constant 0 : index
      %59 = vector.load %arg4[%c0_17, %c0_18, %c0_19] : memref<1x80x128xf32, #tpu.memory_space<vmem>>, vector<1x8x128xf32>
      %60 = vector.shape_cast %59 : vector<1x8x128xf32> to vector<8x128xf32>
      %61 = arith.addf %60, %46 : vector<8x128xf32>
      %c0_20 = arith.constant 0 : index
      %c0_21 = arith.constant 0 : index
      %c0_22 = arith.constant 0 : index
      %62 = vector.load %arg4[%c0_20, %c0_21, %c0_22] : memref<1x80x128xf32, #tpu.memory_space<vmem>>, vector<1x8x128xf32>
      %63 = vector.shape_cast %62 : vector<1x8x128xf32> to vector<8x128xf32>
      %64 = vector.shape_cast %61 : vector<8x128xf32> to vector<1x8x128xf32>
      tpu.vector_store %arg4[%c0_20, %c0_21, %c0_22], %64 {strides = array<i32>} : memref<1x80x128xf32, #tpu.memory_space<vmem>>, vector<1x8x128xf32>,
      %c0_23 = arith.constant 0 : index
      %c8 = arith.constant 8 : index
      %c0_24 = arith.constant 0 : index
      %65 = vector.load %arg4[%c0_23, %c8, %c0_24] : memref<1x80x128xf32, #tpu.memory_space<vmem>>, vector<1x8x128xf32>
      %66 = vector.shape_cast %65 : vector<1x8x128xf32> to vector<8x128xf32>
      %67 = arith.addf %66, %47 : vector<8x128xf32>
      %c0_25 = arith.constant 0 : index
      %c8_26 = arith.constant 8 : index
      %c0_27 = arith.constant 0 : index
      %68 = vector.load %arg4[%c0_25, %c8_26, %c0_27] : memref<1x80x128xf32, #tpu.memory_space<vmem>>, vector<1x8x128xf32>
      %69 = vector.shape_cast %68 : vector<1x8x128xf32> to vector<8x128xf32>
      %70 = vector.shape_cast %67 : vector<8x128xf32> to vector<1x8x128xf32>
      tpu.vector_store %arg4[%c0_25, %c8_26, %c0_27], %70 {strides = array<i32>} : memref<1x80x128xf32, #tpu.memory_space<vmem>>, vector<1x8x128xf32>,
      %c0_28 = arith.constant 0 : index
      %c16 = arith.constant 16 : index
      %c0_29 = arith.constant 0 : index
      %71 = vector.load %arg4[%c0_28, %c16, %c0_29] : memref<1x80x128xf32, #tpu.memory_space<vmem>>, vector<1x8x128xf32>
      %72 = vector.shape_cast %71 : vector<1x8x128xf32> to vector<8x128xf32>
      %73 = arith.addf %72, %48 : vector<8x128xf32>
      %c0_30 = arith.constant 0 : index
      %c16_31 = arith.constant 16 : index
      %c0_32 = arith.constant 0 : index
      %74 = vector.load %arg4[%c0_30, %c16_31, %c0_32] : memref<1x80x128xf32, #tpu.memory_space<vmem>>, vector<1x8x128xf32>
      %75 = vector.shape_cast %74 : vector<1x8x128xf32> to vector<8x128xf32>
      %76 = vector.shape_cast %73 : vector<8x128xf32> to vector<1x8x128xf32>
      tpu.vector_store %arg4[%c0_30, %c16_31, %c0_32], %76 {strides = array<i32>} : memref<1x80x128xf32, #tpu.memory_space<vmem>>, vector<1x8x128xf32>,
      %c0_33 = arith.constant 0 : index
      %c24 = arith.constant 24 : index
      %c0_34 = arith.constant 0 : index
      %77 = vector.load %arg4[%c0_33, %c24, %c0_34] : memref<1x80x128xf32, #tpu.memory_space<vmem>>, vector<1x8x128xf32>
      %78 = vector.shape_cast %77 : vector<1x8x128xf32> to vector<8x128xf32>
      %79 = arith.addf %78, %50 : vector<8x128xf32>
      %c0_35 = arith.constant 0 : index
      %c24_36 = arith.constant 24 : index
      %c0_37 = arith.constant 0 : index
      %80 = vector.load %arg4[%c0_35, %c24_36, %c0_37] : memref<1x80x128xf32, #tpu.memory_space<vmem>>, vector<1x8x128xf32>
      %81 = vector.shape_cast %80 : vector<1x8x128xf32> to vector<8x128xf32>
      %82 = vector.shape_cast %79 : vector<8x128xf32> to vector<1x8x128xf32>
      tpu.vector_store %arg4[%c0_35, %c24_36, %c0_37], %82 {strides = array<i32>} : memref<1x80x128xf32, #tpu.memory_space<vmem>>, vector<1x8x128xf32>,
      %c0_38 = arith.constant 0 : index
      %c32 = arith.constant 32 : index
      %c0_39 = arith.constant 0 : index
      %83 = vector.load %arg4[%c0_38, %c32, %c0_39] : memref<1x80x128xf32, #tpu.memory_space<vmem>>, vector<1x8x128xf32>
      %84 = vector.shape_cast %83 : vector<1x8x128xf32> to vector<8x128xf32>
      %85 = arith.addf %84, %52 : vector<8x128xf32>
      %c0_40 = arith.constant 0 : index
      %c32_41 = arith.constant 32 : index
      %c0_42 = arith.constant 0 : index
      %86 = vector.load %arg4[%c0_40, %c32_41, %c0_42] : memref<1x80x128xf32, #tpu.memory_space<vmem>>, vector<1x8x128xf32>
      %87 = vector.shape_cast %86 : vector<1x8x128xf32> to vector<8x128xf32>
      %88 = vector.shape_cast %85 : vector<8x128xf32> to vector<1x8x128xf32>
      tpu.vector_store %arg4[%c0_40, %c32_41, %c0_42], %88 {strides = array<i32>} : memref<1x80x128xf32, #tpu.memory_space<vmem>>, vector<1x8x128xf32>,
      %c0_43 = arith.constant 0 : index
      %c40 = arith.constant 40 : index
      %c0_44 = arith.constant 0 : index
      %89 = vector.load %arg4[%c0_43, %c40, %c0_44] : memref<1x80x128xf32, #tpu.memory_space<vmem>>, vector<1x8x128xf32>
      %90 = vector.shape_cast %89 : vector<1x8x128xf32> to vector<8x128xf32>
      %91 = arith.addf %90, %54 : vector<8x128xf32>
      %c0_45 = arith.constant 0 : index
      %c40_46 = arith.constant 40 : index
      %c0_47 = arith.constant 0 : index
      %92 = vector.load %arg4[%c0_45, %c40_46, %c0_47] : memref<1x80x128xf32, #tpu.memory_space<vmem>>, vector<1x8x128xf32>
      %93 = vector.shape_cast %92 : vector<1x8x128xf32> to vector<8x128xf32>
      %94 = vector.shape_cast %91 : vector<8x128xf32> to vector<1x8x128xf32>
      tpu.vector_store %arg4[%c0_45, %c40_46, %c0_47], %94 {strides = array<i32>} : memref<1x80x128xf32, #tpu.memory_space<vmem>>, vector<1x8x128xf32>,
      %c0_48 = arith.constant 0 : index
      %c48 = arith.constant 48 : index
      %c0_49 = arith.constant 0 : index
      %95 = vector.load %arg4[%c0_48, %c48, %c0_49] : memref<1x80x128xf32, #tpu.memory_space<vmem>>, vector<1x8x128xf32>
      %96 = vector.shape_cast %95 : vector<1x8x128xf32> to vector<8x128xf32>
      %97 = arith.minimumf %96, %55 : vector<8x128xf32>
      %c0_50 = arith.constant 0 : index
      %c48_51 = arith.constant 48 : index
      %c0_52 = arith.constant 0 : index
      %98 = vector.load %arg4[%c0_50, %c48_51, %c0_52] : memref<1x80x128xf32, #tpu.memory_space<vmem>>, vector<1x8x128xf32>
      %99 = vector.shape_cast %98 : vector<1x8x128xf32> to vector<8x128xf32>
      %100 = vector.shape_cast %97 : vector<8x128xf32> to vector<1x8x128xf32>
      tpu.vector_store %arg4[%c0_50, %c48_51, %c0_52], %100 {strides = array<i32>} : memref<1x80x128xf32, #tpu.memory_space<vmem>>, vector<1x8x128xf32>,
      %c0_53 = arith.constant 0 : index
      %c56 = arith.constant 56 : index
      %c0_54 = arith.constant 0 : index
      %101 = vector.load %arg4[%c0_53, %c56, %c0_54] : memref<1x80x128xf32, #tpu.memory_space<vmem>>, vector<1x8x128xf32>
      %102 = vector.shape_cast %101 : vector<1x8x128xf32> to vector<8x128xf32>
      %103 = arith.minimumf %102, %56 : vector<8x128xf32>
      %c0_55 = arith.constant 0 : index
      %c56_56 = arith.constant 56 : index
      %c0_57 = arith.constant 0 : index
      %104 = vector.load %arg4[%c0_55, %c56_56, %c0_57] : memref<1x80x128xf32, #tpu.memory_space<vmem>>, vector<1x8x128xf32>
      %105 = vector.shape_cast %104 : vector<1x8x128xf32> to vector<8x128xf32>
      %106 = vector.shape_cast %103 : vector<8x128xf32> to vector<1x8x128xf32>
      tpu.vector_store %arg4[%c0_55, %c56_56, %c0_57], %106 {strides = array<i32>} : memref<1x80x128xf32, #tpu.memory_space<vmem>>, vector<1x8x128xf32>,
      %c0_58 = arith.constant 0 : index
      %c64 = arith.constant 64 : index
      %c0_59 = arith.constant 0 : index
      %107 = vector.load %arg4[%c0_58, %c64, %c0_59] : memref<1x80x128xf32, #tpu.memory_space<vmem>>, vector<1x8x128xf32>
      %108 = vector.shape_cast %107 : vector<1x8x128xf32> to vector<8x128xf32>
      %109 = arith.maximumf %108, %57 : vector<8x128xf32>
      %c0_60 = arith.constant 0 : index
      %c64_61 = arith.constant 64 : index
      %c0_62 = arith.constant 0 : index
      %110 = vector.load %arg4[%c0_60, %c64_61, %c0_62] : memref<1x80x128xf32, #tpu.memory_space<vmem>>, vector<1x8x128xf32>
      %111 = vector.shape_cast %110 : vector<1x8x128xf32> to vector<8x128xf32>
      %112 = vector.shape_cast %109 : vector<8x128xf32> to vector<1x8x128xf32>
      tpu.vector_store %arg4[%c0_60, %c64_61, %c0_62], %112 {strides = array<i32>} : memref<1x80x128xf32, #tpu.memory_space<vmem>>, vector<1x8x128xf32>,
      %c0_63 = arith.constant 0 : index
      %c72 = arith.constant 72 : index
      %c0_64 = arith.constant 0 : index
      %113 = vector.load %arg4[%c0_63, %c72, %c0_64] : memref<1x80x128xf32, #tpu.memory_space<vmem>>, vector<1x8x128xf32>
      %114 = vector.shape_cast %113 : vector<1x8x128xf32> to vector<8x128xf32>
      %115 = arith.maximumf %114, %58 : vector<8x128xf32>
      %c0_65 = arith.constant 0 : index
      %c72_66 = arith.constant 72 : index
      %c0_67 = arith.constant 0 : index
      %116 = vector.load %arg4[%c0_65, %c72_66, %c0_67] : memref<1x80x128xf32, #tpu.memory_space<vmem>>, vector<1x8x128xf32>
      %117 = vector.shape_cast %116 : vector<1x8x128xf32> to vector<8x128xf32>
      %118 = vector.shape_cast %115 : vector<8x128xf32> to vector<1x8x128xf32>
      tpu.vector_store %arg4[%c0_65, %c72_66, %c0_67], %118 {strides = array<i32>} : memref<1x80x128xf32, #tpu.memory_space<vmem>>, vector<1x8x128xf32>,
    } else {
    }
    return
  }
  func.func @transform_0(%arg0: i32, %arg1: i32) -> (i32, i32) {
    %c1_i32 = arith.constant 1 : i32
    %0 = arith.muli %arg0, %c1_i32 : i32
    %1 = arith.addi %0, %arg1 : i32
    %c0_i32 = arith.constant 0 : i32
    %2 = arith.minsi %1, %c0_i32 : i32
    %c0_i32_0 = arith.constant 0 : i32
    %c0_i32_1 = arith.constant 0 : i32
    return %2, %c0_i32_0 : i32, i32
  }
  func.func @transform_1(%arg0: i32, %arg1: i32) -> (i32, i32) {
    %c1_i32 = arith.constant 1 : i32
    %0 = arith.muli %arg0, %c1_i32 : i32
    %1 = arith.addi %0, %arg1 : i32
    %c0_i32 = arith.constant 0 : i32
    %2 = arith.minsi %1, %c0_i32 : i32
    %c0_i32_0 = arith.constant 0 : i32
    %c0_i32_1 = arith.constant 0 : i32
    return %2, %c0_i32_0 : i32, i32
  }
  func.func @transform_2(%arg0: i32, %arg1: i32) -> (i32, i32, i32) {
    %c0_i32 = arith.constant 0 : i32
    %c0_i32_0 = arith.constant 0 : i32
    %c0_i32_1 = arith.constant 0 : i32
    return %arg0, %c0_i32, %c0_i32_0 : i32, i32, i32
  }
}

</mosaic_0001>

<bundles_post_ra>
// kernel: tpu_custom_call.1
= control target key start
LH: loop header
LB: loop body
LE: loop exit
PB: predicated region body
PF: predicated region fallthrough
CT: control target
= control target key end

     0   :  { %7 = vsyncpa [#allocation3], 0  ;;  %s303_s0 = inlined_call_operand.hbm [shape: f32[8,128], index: 0, kind: input, shape index: {}]   ;;  %s304_s1 = inlined_call_operand.hbm [shape: f32[8,128], index: 1, kind: input, shape index: {}]   ;;  %s305_s2 = inlined_call_operand.hbm [shape: f32[1,80,128], index: 2, kind: output, shape index: {}]  }
   0x1   :  { %8 = vsyncpa [#allocation6], 0 }
   0x2   :  { %9 = vsyncpa [#allocation4], 0  ;;  %s274_s9 = smov [#allocation2]   ;;  %s275_s11 = smov [#allocation5]  }
   0x3   :  { %s21_s10 = sshll.u32 %s274_s9, 4  ;;  %s36_s12 = sshll.u32 %s275_s11, 4  ;;  %s22_s10 = int_to_ptr.vmem [resolvable:$true] %s21_s10  ;;  %s37_s12 = int_to_ptr.vmem [resolvable:$true] %s36_s12 }
   0x4   :  { %s216_s13 = scalar_lea.vmem %s22_s10, 128  ;;  %p221_p1 = scmp.lt.s32.totalorder %s22_s10, %s22_s10 }
   0x5   :  { %p217_p0 = scmp.ne.s32.totalorder %s22_s10, %s216_s13  ;;  %p222_p2 = scmp.lt.s32.totalorder %s216_s13, %s216_s13 }
   0x7   :  { %p223_p3 = por %p222_p2, %p221_p1 }
   0x9   :  { %p224_p4 = pnand %p223_p3, %p217_p0 }
   0xb   :  { %227 = shalt.err (!%p224_p4)
}
   0xc   :  { %24 = dma.hbm_to_vmem [thread:$0]  %s303_s0, 128, %s22_s10, [#allocation3]  }
   0xd   :  { %s236_s16 = scalar_lea.vmem %s37_s12, 128  ;;  %p241_p6 = scmp.lt.s32.totalorder %s37_s12, %s37_s12 }
   0xe   :  { %p237_p5 = scmp.ne.s32.totalorder %s37_s12, %s236_s16  ;;  %p242_p7 = scmp.lt.s32.totalorder %s236_s16, %s236_s16 }
  0x10   :  { %p243_p8 = por %p242_p7, %p241_p6 }
  0x12   :  { %p244_p9 = pnand %p243_p8, %p237_p5 }
  0x14   :  { %247 = shalt.err (!%p244_p9)
}
  0x15   :  { %39 = dma.hbm_to_vmem [thread:$0]  %s304_s1, 128, %s37_s12, [#allocation6]  }
  0x16   :  { %268 = dma.done.wait [#allocation3], 128  }
  0x17   :  { %269 = vsyncadd [#allocation3], 4294967168 }
  0x18   :  { %270 = dma.done.wait [#allocation6], 128  }
  0x19   :  { %271 = vsyncadd [#allocation6], 4294967168  ;;  %v120_v0 = vlaneseq  ;;  %v126_v5 = vld [vmem:[#allocation2] sm:$0xff]  ;;  %v127_v6 = vld [vmem:[#allocation5] sm:$0xff]  ;;  %s276_s0 = smov [#allocation7]  }
  0x1a   :  { %s183_s1 = sshll.u32 %s276_s0, 4  ;;  %s184_s1 = int_to_ptr.vmem [resolvable:$true] %s183_s1 }
  0x1b   :  { %v121_v1 = vshrl.u32 %v120_v0, 7  ;;  %v124_v2 = vand.u32 127, %v120_v0  ;;  %s248_s19 = scalar_lea.vmem %s184_s1, 1280  ;;  %p253_p11 = scmp.lt.s32.totalorder %s184_s1, %s184_s1 }
  0x1c   :  { %p249_p10 = scmp.ne.s32.totalorder %s184_s1, %s248_s19  ;;  %p254_p12 = scmp.lt.s32.totalorder %s248_s19, %s248_s19 }
  0x1d   :  { %v122_v3 = vmul.u32 128, %v121_v1 }
  0x1e   :  { %p255_p13 = por %p254_p12, %p253_p11 }
  0x1f   :  { %v125_v4 = vadd.s32 %v124_v2, %v122_v3 }
  0x20   :  { %p256_p0 = pnand %p255_p13, %p249_p10 }
  0x21   :  { %vm130_vm0 = vcmp.lt.s32.totalorder %v125_v4, 32 }
  0x22   :  { %v135_v7 = vsel %vm130_vm0, %v126_v5, 0.0  ;;  %v136_v8 = vsel %vm130_vm0, %v127_v6, 0.0  ;;  %v131_v9 = vsel %vm130_vm0, %v126_v5, inf  ;;  %v132_v10 = vsel %vm130_vm0, %v127_v6, inf }
  0x23   :  { %v137_v11 = vsub.f32 %v135_v7, %v136_v8  ;;  %v142_v12 = vmul.f32 %v135_v7, %v135_v7  ;;  %v144_v13 = vmul.f32 %v136_v8, %v136_v8  ;;  %v146_v14 = vmul.f32 %v136_v8, %v135_v7  ;;  %153 = vst [vmem:[#allocation7 + $0x8] sm:$0xff] %v135_v7 }
  0x24   :  { %156 = vst [vmem:[#allocation7 + $0x10] sm:$0xff] %v136_v8  ;;  %v133_v16 = vsel %vm130_vm0, %v126_v5, -inf  ;;  %v134_v17 = vsel %vm130_vm0, %v127_v6, -inf  ;;  %168 = vst [vmem:[#allocation7 + $0x30] sm:$0xff] %v131_v9 }
  0x25   :  { %v138_v15 = vmul.f32 %v137_v11, %v137_v11  ;;  %171 = vst [vmem:[#allocation7 + $0x38] sm:$0xff] %v132_v10  ;;  %159 = vst [vmem:[#allocation7 + $0x18] sm:$0xff] %v142_v12 }
  0x26   :  { %162 = vst [vmem:[#allocation7 + $0x20] sm:$0xff] %v144_v13  ;;  %165 = vst [vmem:[#allocation7 + $0x28] sm:$0xff] %v146_v14 }
  0x27   :  { %174 = vst [vmem:[#allocation7 + $0x40] sm:$0xff] %v133_v16  ;;  %177 = vst [vmem:[#allocation7 + $0x48] sm:$0xff] %v134_v17 }
  0x28   :  { %150 = vst [vmem:[#allocation7] sm:$0xff] %v138_v15 }
  0x29   :  { %259 = shalt.err (!%p256_p0)
}
  0x2a   :  { %s277_s20 = smov 128   ;;  %s278_s21 = smov 8  }
  0x2b   :  { %189 = dma.vmem_to_hbm [thread:$0]  %s184_s1, 1280, %s305_s2, [#allocation4], %s277_s20, %s277_s20, %s278_s21  }
  0x2c   :  { %272 = dma.done.wait [#allocation4], 1280  }
  0x2d   :  { %273 = vsyncadd [#allocation4], 4294966016 }
  0x2e   :  { %193 = vsyncpa [#allocation3], 1 }
  0x2f   :  { %194 = vsyncpa [#allocation6], 1 }
  0x30   :  { %195 = vsyncpa [#allocation4], 1 }

</bundles_post_ra>
